<compile_context>
chip_gen: v7x
topology: tpu7x:2x2x1
jax: 0.10.0
libtpu: 0.0.40
codegen_flags: <defaults>
</compile_context>

<pallas_src>
import functools

import jax
import jax.numpy as jnp
from jax import lax
from jax.experimental import pallas as pl
from jax.experimental.pallas import tpu as pltpu


def _subsample1d_kernel(p_ref, w_ref, b_ref, g_ref, bt_ref, o_ref, *, eps):
    # p_ref : (TM, 9*C_in)    im2col patches, input dtype
    # w_ref : (9*C_in, C_out) fused conv-weight taps, input dtype
    # b/g/bt: (1, C_out)      conv bias / LN gamma / LN beta, f32
    # o_ref : (TM, C_out)
    acc = jnp.dot(p_ref[...], w_ref[...], preferred_element_type=jnp.float32)
    acc = acc + b_ref[...]                                  # conv bias

    # LayerNorm over channels (last / lane dim), f32 math.
    mean = jnp.mean(acc, axis=-1, keepdims=True)
    cen = acc - mean
    var = jnp.mean(cen * cen, axis=-1, keepdims=True)
    y = cen * lax.rsqrt(var + eps)
    y = y * g_ref[...] + bt_ref[...]

    o_ref[...] = y.astype(o_ref.dtype)


def _pick_tile_m(m_total, max_tm=512):
    """Largest row tile <= max_tm, multiple of 8, keeping >=2 grid steps when
    there is enough work (v7x has 2 TensorCores on the 'parallel' axis)."""
    tm = min(max_tm, m_total)
    if m_total > 16 and pl.cdiv(m_total, tm) < 2:
        tm = pl.cdiv(m_total, 2)
    return max(8, ((tm + 7) // 8) * 8)


def subsample1d(x, sz, params, stride=(2, 1), eps=1e-5):
    """x: [B, N, C_in] with N = sz[0]*sz[1].
    Returns (y [B, H_out*W_out, C_out], [H_out, W_out])."""
    conv_w, conv_b, ln_gamma, ln_beta = params              # conv_w: [C_out, C_in, 3, 3]
    c_out, c_in = conv_w.shape[:2]
    B, N, C = x.shape
    H, W = sz
    sh, sw = stride
    assert N == H * W and C == c_in

    h_out = (H - 1) // sh + 1                               # k=3, pad 1
    w_out = (W - 1) // sw + 1

    # im2col in the wrapper: [B,N,C] -> [B,H,W,C] is a free view of PyTorch's
    # NCHW round trip; padding + tap extraction fuse into the patch tensor.
    x4 = x.reshape(B, H, W, C)
    x_pad = jnp.pad(x4, ((0, 0), (1, 1), (1, 1), (0, 0)))
    taps = []
    for kh in range(3):
        rows = x_pad[:, kh:kh + sh * (h_out - 1) + 1:sh]    # [B, h_out, W+2, C]
        for kw in range(3):
            taps.append(rows[:, :, kw:kw + sw * (w_out - 1) + 1:sw, :])
    patches = jnp.concatenate(taps, axis=-1)                # [B, h_out, w_out, 9C]
    m_total = B * h_out * w_out
    patches = patches.reshape(m_total, 9 * c_in)

    # conv weight [C_out, C_in, 3, 3] -> [9*C_in, C_out], ordering (kh, kw, c)
    # to match the tap concatenation above.  Keep it in the activation dtype.
    w_r = jnp.transpose(conv_w, (2, 3, 1, 0)).reshape(9 * c_in, c_out).astype(x.dtype)
    b_r = conv_b.reshape(1, c_out).astype(jnp.float32)
    g_r = ln_gamma.reshape(1, c_out).astype(jnp.float32)
    bt_r = ln_beta.reshape(1, c_out).astype(jnp.float32)

    tm = _pick_tile_m(m_total)
    grid_m = pl.cdiv(m_total, tm)
    m_pad = grid_m * tm
    if m_pad != m_total:
        # zero rows LayerNorm to beta (no NaNs); they are sliced away below.
        patches = jnp.pad(patches, ((0, m_pad - m_total), (0, 0)))

    kernel = functools.partial(_subsample1d_kernel, eps=eps)

    y = pl.pallas_call(
        kernel,
        out_shape=jax.ShapeDtypeStruct((m_pad, c_out), x.dtype),
        grid_spec=pltpu.PrefetchScalarGridSpec(
            num_scalar_prefetch=0,
            grid=(grid_m,),
            in_specs=[
                pl.BlockSpec((tm, 9 * c_in), lambda i: (i, 0)),     # patches
                pl.BlockSpec((9 * c_in, c_out), lambda i: (0, 0)),  # fused weight
                pl.BlockSpec((1, c_out), lambda i: (0, 0)),         # conv bias
                pl.BlockSpec((1, c_out), lambda i: (0, 0)),         # LN gamma
                pl.BlockSpec((1, c_out), lambda i: (0, 0)),         # LN beta
            ],
            out_specs=pl.BlockSpec((tm, c_out), lambda i: (i, 0)),
        ),
        compiler_params=pltpu.CompilerParams(
            dimension_semantics=("parallel",),
            vmem_limit_bytes=48 * 1024 * 1024,
        ),
    )(patches, w_r, b_r, g_r, bt_r)

    y = y[:m_total].reshape(B, h_out * w_out, c_out)
    return y, [h_out, w_out]


def reference(x, sz, params, stride=(2, 1), eps=1e-5):
    """Pure-JAX reference mirroring the PyTorch forward exactly."""
    conv_w, conv_b, ln_gamma, ln_beta = params
    B, N, C = x.shape
    H, W = sz
    x_nchw = jnp.transpose(x, (0, 2, 1)).reshape(B, C, H, W)
    y = lax.conv_general_dilated(
        x_nchw, conv_w, window_strides=stride, padding=((1, 1), (1, 1)),
        dimension_numbers=("NCHW", "OIHW", "NCHW"))
    y = y + conv_b.reshape(1, -1, 1, 1)
    c_out, h_out, w_out = y.shape[1:]
    y = y.reshape(B, c_out, h_out * w_out).transpose(0, 2, 1)
    mean = y.mean(-1, keepdims=True)
    var = ((y - mean) ** 2).mean(-1, keepdims=True)
    y = (y - mean) / jnp.sqrt(var + eps) * ln_gamma + ln_beta
    return y, [h_out, w_out]


if __name__ == "__main__":
    B, C_in, C_out = 2, 16, 32
    H, W = 8, 16

    key = jax.random.PRNGKey(0)
    ks = jax.random.split(key, 5)
    x = jax.random.normal(ks[0], (B, H * W, C_in), jnp.float32)
    conv_w = 0.1 * jax.random.normal(ks[1], (C_out, C_in, 3, 3), jnp.float32)
    conv_b = 0.1 * jax.random.normal(ks[2], (C_out,), jnp.float32)
    ln_gamma = 1.0 + 0.1 * jax.random.normal(ks[3], (C_out,), jnp.float32)
    ln_beta = 0.1 * jax.random.normal(ks[4], (C_out,), jnp.float32)
    params = (conv_w, conv_b, ln_gamma, ln_beta)

    y, out_sz = subsample1d(x, [H, W], params)
    y = jax.block_until_ready(y)

    y_ref, ref_sz = reference(x, [H, W], params)
    assert y.shape == (B, (H // 2) * W, C_out), y.shape
    assert out_sz == ref_sz == [H // 2, W]
    err = float(jnp.max(jnp.abs(y - y_ref)))
    assert jnp.allclose(y, y_ref, atol=2e-4, rtol=2e-4), f"max abs err {err}"

    print("KERNEL_OK")
</pallas_src>

<mosaic_0001>
module attributes {stable_mosaic.version = 11 : i64} {
  func.func @_subsample1d_kernel(%arg0: i32, %arg1: memref<64x144xf32, #tpu.memory_space<vmem>>, %arg2: memref<144x32xf32, #tpu.memory_space<vmem>>, %arg3: memref<1x32xf32, #tpu.memory_space<vmem>>, %arg4: memref<1x32xf32, #tpu.memory_space<vmem>>, %arg5: memref<1x32xf32, #tpu.memory_space<vmem>>, %arg6: memref<64x32xf32, #tpu.memory_space<vmem>>) attributes {dimension_semantics = [#tpu.dimension_semantics<parallel>], iteration_bounds = array<i64: 2>, scalar_prefetch = 0 : i64, scratch_operands = 0 : i64, tpu.core_type = #tpu.core_type<tc>, window_params = [{transform_indices = @transform_0, window_bounds = array<i64: 64, 144>}, {pipeline_mode = #tpu.pipeline_mode<synchronous>, transform_indices = @transform_1, window_bounds = array<i64: 144, 32>}, {pipeline_mode = #tpu.pipeline_mode<synchronous>, transform_indices = @transform_2, window_bounds = array<i64: 1, 32>}, {pipeline_mode = #tpu.pipeline_mode<synchronous>, transform_indices = @transform_3, window_bounds = array<i64: 1, 32>}, {pipeline_mode = #tpu.pipeline_mode<synchronous>, transform_indices = @transform_4, window_bounds = array<i64: 1, 32>}, {transform_indices = @transform_5, window_bounds = array<i64: 64, 32>}]} {
    %c0 = arith.constant 0 : index
    %c0_0 = arith.constant 0 : index
    %0 = vector.load %arg1[%c0, %c0_0] : memref<64x144xf32, #tpu.memory_space<vmem>>, vector<64x144xf32>
    %c0_1 = arith.constant 0 : index
    %c0_2 = arith.constant 0 : index
    %1 = vector.load %arg2[%c0_1, %c0_2] : memref<144x32xf32, #tpu.memory_space<vmem>>, vector<144x32xf32>
    %cst = arith.constant dense<0.000000e+00> : vector<64x32xf32>
    %2 = tpu.matmul %0, %1, %cst {dimension_numbers = #tpu.dot_dimension_numbers<[1], [0], [0], [1], [0, 0, 1, 1], [], []>} : vector<64x144xf32>, vector<144x32xf32>, vector<64x32xf32> -> vector<64x32xf32>
    %c0_3 = arith.constant 0 : index
    %c0_4 = arith.constant 0 : index
    %3 = vector.load %arg3[%c0_3, %c0_4] : memref<1x32xf32, #tpu.memory_space<vmem>>, vector<1x32xf32>
    %4 = vector.broadcast %3 : vector<1x32xf32> to vector<64x32xf32>
    %5 = arith.addf %2, %4 : vector<64x32xf32>
    %cst_5 = arith.constant dense<0.000000e+00> : vector<64xf32>
    %6 = vector.multi_reduction <add>, %5, %cst_5 [1] : vector<64x32xf32> to vector<64xf32>
    %7 = vector.shape_cast %6 : vector<64xf32> to vector<64x1xf32>
    %cst_6 = arith.constant 3.200000e+01 : f32
    %8 = vector.broadcast %cst_6 : f32 to vector<64x1xf32>
    %9 = arith.divf %7, %8 : vector<64x1xf32>
    %10 = vector.broadcast %9 : vector<64x1xf32> to vector<64x32xf32>
    %11 = arith.subf %5, %10 : vector<64x32xf32>
    %12 = arith.mulf %11, %11 : vector<64x32xf32>
    %cst_7 = arith.constant dense<0.000000e+00> : vector<64xf32>
    %13 = vector.multi_reduction <add>, %12, %cst_7 [1] : vector<64x32xf32> to vector<64xf32>
    %14 = vector.shape_cast %13 : vector<64xf32> to vector<64x1xf32>
    %cst_8 = arith.constant 3.200000e+01 : f32
    %15 = vector.broadcast %cst_8 : f32 to vector<64x1xf32>
    %16 = arith.divf %14, %15 : vector<64x1xf32>
    %cst_9 = arith.constant 9.99999974E-6 : f32
    %17 = vector.broadcast %cst_9 : f32 to vector<64x1xf32>
    %18 = arith.addf %16, %17 : vector<64x1xf32>
    %19 = math.rsqrt %18 : vector<64x1xf32>
    %20 = vector.broadcast %19 : vector<64x1xf32> to vector<64x32xf32>
    %21 = arith.mulf %11, %20 : vector<64x32xf32>
    %c0_10 = arith.constant 0 : index
    %c0_11 = arith.constant 0 : index
    %22 = vector.load %arg4[%c0_10, %c0_11] : memref<1x32xf32, #tpu.memory_space<vmem>>, vector<1x32xf32>
    %23 = vector.broadcast %22 : vector<1x32xf32> to vector<64x32xf32>
    %24 = arith.mulf %21, %23 : vector<64x32xf32>
    %c0_12 = arith.constant 0 : index
    %c0_13 = arith.constant 0 : index
    %25 = vector.load %arg5[%c0_12, %c0_13] : memref<1x32xf32, #tpu.memory_space<vmem>>, vector<1x32xf32>
    %26 = vector.broadcast %25 : vector<1x32xf32> to vector<64x32xf32>
    %27 = arith.addf %24, %26 : vector<64x32xf32>
    %c0_14 = arith.constant 0 : index
    %c0_15 = arith.constant 0 : index
    %28 = vector.load %arg6[%c0_14, %c0_15] : memref<64x32xf32, #tpu.memory_space<vmem>>, vector<64x32xf32>
    tpu.vector_store %arg6[%c0_14, %c0_15], %27 {strides = array<i32>} : memref<64x32xf32, #tpu.memory_space<vmem>>, vector<64x32xf32>,
    return
  }
  func.func @transform_0(%arg0: i32) -> (i32, i32) {
    %c0_i32 = arith.constant 0 : i32
    %c0_i32_0 = arith.constant 0 : i32
    return %arg0, %c0_i32 : i32, i32
  }
  func.func @transform_1(%arg0: i32) -> (i32, i32) {
    %c0_i32 = arith.constant 0 : i32
    %c0_i32_0 = arith.constant 0 : i32
    %c0_i32_1 = arith.constant 0 : i32
    return %c0_i32, %c0_i32_0 : i32, i32
  }
  func.func @transform_2(%arg0: i32) -> (i32, i32) {
    %c0_i32 = arith.constant 0 : i32
    %c0_i32_0 = arith.constant 0 : i32
    %c0_i32_1 = arith.constant 0 : i32
    return %c0_i32, %c0_i32_0 : i32, i32
  }
  func.func @transform_3(%arg0: i32) -> (i32, i32) {
    %c0_i32 = arith.constant 0 : i32
    %c0_i32_0 = arith.constant 0 : i32
    %c0_i32_1 = arith.constant 0 : i32
    return %c0_i32, %c0_i32_0 : i32, i32
  }
  func.func @transform_4(%arg0: i32) -> (i32, i32) {
    %c0_i32 = arith.constant 0 : i32
    %c0_i32_0 = arith.constant 0 : i32
    %c0_i32_1 = arith.constant 0 : i32
    return %c0_i32, %c0_i32_0 : i32, i32
  }
  func.func @transform_5(%arg0: i32) -> (i32, i32) {
    %c0_i32 = arith.constant 0 : i32
    %c0_i32_0 = arith.constant 0 : i32
    return %arg0, %c0_i32 : i32, i32
  }
}

</mosaic_0001>

<bundles_post_ra>
// kernel: tpu_custom_call.1
= control target key start
LH: loop header
LB: loop body
LE: loop exit
PB: predicated region body
PF: predicated region fallthrough
CT: control target
= control target key end

     0   :  { %s735_s18 = smov 0   ;;  %s937_s0 = inlined_call_operand.vmem [shape: f32[128,144], index: 0, kind: input, shape index: {}]   ;;  %s938_s1 = inlined_call_operand.vmem [shape: f32[144,32], index: 1, kind: input, shape index: {}]   ;;  %s939_s2 = inlined_call_operand.vmem [shape: f32[1,32], index: 2, kind: input, shape index: {}]   ;;  %s940_s3 = inlined_call_operand.vmem [shape: f32[1,32], index: 3, kind: input, shape index: {}]   ;;  %s941_s4 = inlined_call_operand.vmem [shape: f32[1,32], index: 4, kind: input, shape index: {}]   ;;  %s942_s5 = inlined_call_operand.vmem [shape: f32[128,32], index: 5, kind: output, shape index: {}]  }
   0x1 LB: > { %s602_s19 = sadd.s32 4294967295, %s702_s18   ;;  %p606_p0 = scmp.ge.s32.totalorder %s702_s18, 1  ;;  %s702_s18 = sphi %s735_s18, %s15_s18  }
   0x2   : > { %p189_p1 = scmp.lt.s32.totalorder %s702_s18, 3 }
   0x4   : > { %p190_p2 = pnand %p606_p0, %p189_p1 }
   0x5   : > { %v247_v0 = vld [vmem:[%s938_s1] sm:$0xff] (!%p190_p2)  ;;  %v248_v1 = vld [vmem:[%s938_s1 + $0x8] sm:$0xff] (!%p190_p2)  ;;  %v249_v2 = vld [vmem:[%s938_s1 + $0x10] sm:$0xff] (!%p190_p2)  ;;  %s607_s26 = sshll.u32 (!%p190_p2), %s602_s19, 3  ;;  %v704_v3 = vmov (!%p190_p2), 0.0|0.0   ;;  %vm272_vm0 = vcmask (!%p190_p2), 130048  }
   0x6   : > { %193 = sbr.rel (%p190_p2) target bundleno = 591 (0x24f), region = 40  ;;  %626 = vmatprep.subr.bf16.mxu0 (!%p190_p2), %v704_v3  ;;  %653 = vmatprep.subr.bf16.mxu1 (!%p190_p2), %v704_v3  ;;  %v627_v4 = vpack.c.bf16 (!%p190_p2), %v248_v1, %v247_v0  ;;  %v250_v5 = vld [vmem:[%s938_s1 + $0x18] sm:$0xff] (!%p190_p2)  ;;  %p219_p3 = scmp.lt.s32.totalorder (!%p190_p2), %s607_s26, 15  ;;  %v251_v7 = vld [vmem:[%s938_s1 + $0x20] sm:$0xff] (!%p190_p2)  ;;  %v252_v8 = vld [vmem:[%s938_s1 + $0x28] sm:$0xff] (!%p190_p2)  ;;  %vm402_vm1 = vcmask (!%p190_p2), 261120  }
   0x7   : > { %v630_v6 = vpack.c.bf16 (!%p190_p2), %v250_v5, %v249_v2  ;;  %v633_v9 = vpack.c.bf16 (!%p190_p2), %v252_v8, %v251_v7  ;;  %v253_v12 = vld [vmem:[%s938_s1 + $0x30] sm:$0xff] (!%p190_p2)  ;;  %v254_v13 = vld [vmem:[%s938_s1 + $0x38] sm:$0xff] (!%p190_p2)  ;;  %v255_v15 = vld [vmem:[%s938_s1 + $0x40] sm:$0xff] (!%p190_p2) }
   0x8   : > { %628 = vmatpush1.bf16.msra.mxu0 (!%p190_p2), %v627_v4  ;;  %662 = vmatpush1.bf16.msra.mxu1 (!%p190_p2), %v627_v4  ;;  %v636_v14 = vpack.c.bf16 (!%p190_p2), %v254_v13, %v253_v12  ;;  %v256_v16 = vld [vmem:[%s938_s1 + $0x48] sm:$0xff] (!%p190_p2)  ;;  %v257_v18 = vld [vmem:[%s938_s1 + $0x50] sm:$0xff] (!%p190_p2)  ;;  %v258_v19 = vld [vmem:[%s938_s1 + $0x58] sm:$0xff] (!%p190_p2) }
   0x9   : > { %629 = vmatprep.subr.bf16.mxu0 (!%p190_p2), %v704_v3  ;;  %654 = vmatprep.subr.bf16.mxu1 (!%p190_p2), %v704_v3  ;;  %v639_v17 = vpack.c.bf16 (!%p190_p2), %v256_v16, %v255_v15  ;;  %v642_v20 = vpack.c.bf16 (!%p190_p2), %v258_v19, %v257_v18  ;;  %v259_v21 = vld [vmem:[%s938_s1 + $0x60] sm:$0xff] (!%p190_p2)  ;;  %v260_v22 = vld [vmem:[%s938_s1 + $0x68] sm:$0xff] (!%p190_p2)  ;;  %v261_v24 = vld [vmem:[%s938_s1 + $0x70] sm:$0xff] (!%p190_p2) }
   0xa   : > { %v645_v23 = vpack.c.bf16 (!%p190_p2), %v260_v22, %v259_v21  ;;  %v262_v25 = vld [vmem:[%s938_s1 + $0x78] sm:$0xff] (!%p190_p2)  ;;  %v263_v27 = vld [vmem:[%s938_s1 + $0x80] sm:$0xff] (!%p190_p2)  ;;  %v264_v28 = vld [vmem:[%s938_s1 + $0x88] sm:$0xff] (!%p190_p2) }
   0xb   : > { %v648_v26 = vpack.c.bf16 (!%p190_p2), %v262_v25, %v261_v24  ;;  %v651_v29 = vpack.c.bf16 (!%p190_p2), %v264_v28, %v263_v27  ;;  %v612_v44 = vld [vmem:[%s939_s2] ss:$0 sm:$0xff] (!%p190_p2) }
   0xc   : > { %631 = vmatpush1.bf16.msra.mxu0 (!%p190_p2), %v630_v6  ;;  %663 = vmatpush1.bf16.msra.mxu1 (!%p190_p2), %v630_v6 }
   0xd   : > { %s944_s26 = smov (!%p219_p3, %s607_s26), 15  ;;  %632 = vmatprep.subr.bf16.mxu0 %v704_v3  ;;  %655 = vmatprep.subr.bf16.mxu1 %v704_v3 }
   0xe   : > { %s625_s8 = sshll.u32 %s944_s26, 4  ;;  %s611_s17 = sshll.u32 %s944_s26, 3 }
   0xf   : > { %s771_s11 = scalar_lea.vmem %s937_s0, %s625_s8  ;;  %s909_s23 = scalar_lea.vmem %s942_s5, %s611_s17 }
  0x10   : > { %v232_v10 = vld [vmem:[%s771_s11 + $0x8] sm:$0xff]  ;;  %634 = vmatpush1.bf16.msra.mxu0 %v633_v9  ;;  %664 = vmatpush1.bf16.msra.mxu1 %v633_v9  ;;  %v231_v30 = vld [vmem:[%s771_s11] sm:$0xff]  ;;  %v234_v32 = vld [vmem:[%s771_s11 + $0x18] sm:$0xff] }
  0x11   : > { %v240_v11 = vld [vmem:[%s771_s11 + $0x48] sm:$0xff]  ;;  %613 = vmatprep.mubr.msk.f32.mxu0 %vm272_vm0, %v232_v10  ;;  %635 = vmatprep.subr.bf16.mxu0 %v704_v3  ;;  %v239_v31 = vld [vmem:[%s771_s11 + $0x40] sm:$0xff]  ;;  %v242_v33 = vld [vmem:[%s771_s11 + $0x58] sm:$0xff] }
  0x12   : > { %617 = vmatprep.mubr.msk.f32.mxu1 %vm272_vm0, %v240_v11  ;;  %656 = vmatprep.subr.bf16.mxu1 %v704_v3  ;;  %v233_v34 = vld [vmem:[%s771_s11 + $0x10] sm:$0xff]  ;;  %v236_v36 = vld [vmem:[%s771_s11 + $0x28] sm:$0xff]  ;;  %v235_v38 = vld [vmem:[%s771_s11 + $0x20] sm:$0xff] }
  0x13   : > { %v241_v35 = vld [vmem:[%s771_s11 + $0x50] sm:$0xff]  ;;  %v244_v37 = vld [vmem:[%s771_s11 + $0x68] sm:$0xff]  ;;  %v243_v39 = vld [vmem:[%s771_s11 + $0x60] sm:$0xff] }
  0x14   : > { %637 = vmatpush1.bf16.msra.mxu0 %v636_v14  ;;  %665 = vmatpush1.bf16.msra.mxu1 %v636_v14  ;;  %v238_v40 = vld [vmem:[%s771_s11 + $0x38] sm:$0xff]  ;;  %v237_v42 = vld [vmem:[%s771_s11 + $0x30] sm:$0xff] }
  0x15   : > { %638 = vmatprep.subr.bf16.mxu0 %v704_v3  ;;  %657 = vmatprep.subr.bf16.mxu1 %v704_v3  ;;  %v246_v41 = vld [vmem:[%s771_s11 + $0x78] sm:$0xff]  ;;  %v245_v43 = vld [vmem:[%s771_s11 + $0x70] sm:$0xff] }
  0x18   : > { %640 = vmatpush1.bf16.msra.mxu0 %v639_v17  ;;  %666 = vmatpush1.bf16.msra.mxu1 %v639_v17 }
  0x19   : > { %641 = vmatprep.subr.bf16.mxu0 %v704_v3  ;;  %658 = vmatprep.subr.bf16.mxu1 %v704_v3 }
  0x1c   : > { %643 = vmatpush1.bf16.msra.mxu0 %v642_v20  ;;  %667 = vmatpush1.bf16.msra.mxu1 %v642_v20 }
  0x1d   : > { %644 = vmatprep.subr.bf16.mxu0 %v704_v3  ;;  %659 = vmatprep.subr.bf16.mxu1 %v704_v3 }
  0x20   : > { %646 = vmatpush1.bf16.msra.mxu0 %v645_v23  ;;  %668 = vmatpush1.bf16.msra.mxu1 %v645_v23 }
  0x21   : > { %647 = vmatprep.subr.bf16.mxu0 %v704_v3  ;;  %660 = vmatprep.subr.bf16.mxu1 %v704_v3 }
  0x24   : > { %649 = vmatpush1.bf16.msra.mxu0 %v648_v26  ;;  %669 = vmatpush1.bf16.msra.mxu1 %v648_v26 }
  0x25   : > { %650 = vmatprep.subr.bf16.mxu0 %v704_v3  ;;  %661 = vmatprep.subr.bf16.mxu1 %v704_v3 }
  0x28   : > { %652 = vmatpush1.bf16.msra.mxu0 %v651_v29  ;;  %670 = vmatpush1.bf16.msra.mxu1 %v651_v29 }
  0x2b   : > { %362 = vmatmul.mubr.f32.vlgmr.msra.gmra.mrb[0].mxu0 %v231_v30  ;;  %382 = vmatmul.mubr.f32.vlgmr.msra.gmra.mrb[0].mxu1 %v239_v31 }
  0x2c   : > { %614 = vmatprep.mubr.msk.f32.mxu0 %vm272_vm0, %v234_v32  ;;  %618 = vmatprep.mubr.msk.f32.mxu1 %vm272_vm0, %v242_v33 }
  0x2f   : > { %367 = vmatmul.mubr.f32.gmra.mrb[2].mxu0 %v233_v34  ;;  %387 = vmatmul.mubr.f32.gmra.mrb[2].mxu1 %v241_v35 }
  0x30   : > { %615 = vmatprep.mubr.msk.f32.mxu0 %vm272_vm0, %v236_v36  ;;  %619 = vmatprep.mubr.msk.f32.mxu1 %vm272_vm0, %v244_v37 }
  0x33   : > { %372 = vmatmul.mubr.f32.gmra.mrb[4].mxu0 %v235_v38  ;;  %392 = vmatmul.mubr.f32.gmra.mrb[4].mxu1 %v243_v39 }
  0x34   : > { %616 = vmatprep.mubr.msk.f32.mxu0 %vm272_vm0, %v238_v40  ;;  %620 = vmatprep.mubr.msk.f32.mxu1 %vm272_vm0, %v246_v41 }
  0x37   : > { %377 = vmatmul.mubr.f32.gmra.mrb[6].mxu0 %v237_v42  ;;  %397 = vmatmul.mubr.f32.gmra.mrb[6].mxu1 %v245_v43 }
  0xfe   : > { %v363_v45 = vpop.f32.mrb[0].mxu0  ;;  %v383_v46 = vpop.f32.mrb[0].mxu1 }
  0xff   : > { %v364_v47 = vadd.f32 %v612_v44, %v363_v45  ;;  %v365_v48 = vpop.f32.mrb[1].mxu0  ;;  %v384_v49 = vadd.f32 %v612_v44, %v383_v46  ;;  %v385_v50 = vpop.f32.mrb[1].mxu1 }
 0x101   : > { %v403_v51 = vsel %vm402_vm1, %v364_v47, 0.0  ;;  %v415_v58 = vsel %vm402_vm1, %v384_v49, 0.0 }
 0x102   : > { %v388_v52 = vpop.f32.mrb[2].mxu1  ;;  %404 = vadd.xlane.f32.xlu0 %v403_v51  ;;  %v368_v53 = vpop.f32.mrb[2].mxu0 }
 0x103   : > { %v389_v54 = vadd.f32 %v612_v44, %v388_v52  ;;  %v369_v55 = vadd.f32 %v612_v44, %v368_v53  ;;  %v370_v56 = vpop.f32.mrb[3].mxu0  ;;  %v390_v57 = vpop.f32.mrb[3].mxu1 }
 0x105   : > { %v418_v59 = vsel %vm402_vm1, %v389_v54, 0.0  ;;  %v406_v1 = vsel %vm402_vm1, %v369_v55, 0.0 }
 0x106   : > { %419 = vadd.xlane.f32.xlu1 %v418_v59  ;;  %v373_v60 = vpop.f32.mrb[4].mxu0  ;;  %416 = vadd.xlane.f32.xlu0 %v415_v58  ;;  %v393_v61 = vpop.f32.mrb[4].mxu1 }
 0x107   : > { %v374_v62 = vadd.f32 %v612_v44, %v373_v60  ;;  %v375_v63 = vpop.f32.mrb[5].mxu0  ;;  %v394_v0 = vadd.f32 %v612_v44, %v393_v61  ;;  %v395_v2 = vpop.f32.mrb[5].mxu1 }
 0x109   : > { %v409_v3 = vsel %vm402_vm1, %v374_v62, 0.0  ;;  %v421_v9 = vsel %vm402_vm1, %v394_v0, 0.0 }
 0x10a   : > { %v378_v4 = vpop.f32.mrb[6].mxu0  ;;  %410 = vadd.xlane.f32.xlu1 %v409_v3  ;;  %407 = vadd.xlane.f32.xlu0 %v406_v1  ;;  %v398_v5 = vpop.f32.mrb[6].mxu1 }
 0x10b   : > { %v379_v6 = vadd.f32 %v612_v44, %v378_v4  ;;  %v380_v7 = vpop.f32.mrb[7].mxu0  ;;  %v399_v8 = vadd.f32 %v612_v44, %v398_v5  ;;  %v400_v10 = vpop.f32.mrb[7].mxu1 }
 0x10d   : > { %v412_v11 = vsel %vm402_vm1, %v379_v6, 0.0  ;;  %v424_v12 = vsel %vm402_vm1, %v399_v8, 0.0 }
 0x10e   : > { %413 = vadd.xlane.f32.xlu1 %v412_v11  ;;  %422 = vadd.xlane.f32.xlu0 %v421_v9  ;;  %v622_v11 = vld [vmem:[%s941_s4] ss:$0 sm:$0xff] }
 0x112   : > { %425 = vadd.xlane.f32.xlu1 %v424_v12 }
 0x18f   : > { %v405_v13 = vpop.xlane.xlu0 %404 }
 0x190   : > { %v428_v14 = vmul.f32 0.03125, %v405_v13 }
 0x192   : > { %v858_v15 = vsub.f32 %v364_v47, %v428_v14 }
 0x193   : > { %v420_v16 = vpop.xlane.xlu1 %419  ;;  %v417_v17 = vpop.xlane.xlu0 %416 }
 0x194   : > { %v432_v18 = vmul.f32 0.03125, %v417_v17  ;;  %v444_v19 = vmul.f32 %v858_v15, %v858_v15  ;;  %v433_v20 = vmul.f32 0.03125, %v420_v16 }
 0x196   : > { %v862_v21 = vsub.f32 %v384_v49, %v432_v18  ;;  %v452_v22 = vsel %vm402_vm1, %v444_v19, 0.0  ;;  %v867_v28 = vsub.f32 %v389_v54, %v433_v20 }
 0x197   : > { %v411_v23 = vpop.xlane.xlu1 %410  ;;  %453 = vadd.xlane.f32.xlu0 %v452_v22  ;;  %v408_v24 = vpop.xlane.xlu0 %407 }
 0x198   : > { %v430_v25 = vmul.f32 0.03125, %v411_v23  ;;  %v429_v26 = vmul.f32 0.03125, %v408_v24  ;;  %v448_v27 = vmul.f32 %v862_v21, %v862_v21  ;;  %v449_v38 = vmul.f32 %v867_v28, %v867_v28 }
 0x19a   : > { %v869_v29 = vsub.f32 %v374_v62, %v430_v25  ;;  %v871_v30 = vsub.f32 %v369_v55, %v429_v26  ;;  %v464_v31 = vsel %vm402_vm1, %v448_v27, 0.0  ;;  %v467_v47 = vsel %vm402_vm1, %v449_v38, 0.0 }
 0x19b   : > { %v414_v32 = vpop.xlane.xlu1 %413  ;;  %465 = vadd.xlane.f32.xlu0 %v464_v31  ;;  %v423_v33 = vpop.xlane.xlu0 %422 }
 0x19c   : > { %v431_v34 = vmul.f32 0.03125, %v414_v32  ;;  %v434_v35 = vmul.f32 0.03125, %v423_v33  ;;  %v446_v36 = vmul.f32 %v869_v29, %v869_v29  ;;  %v445_v37 = vmul.f32 %v871_v30, %v871_v30 }
 0x19e   : > { %v880_v39 = vsub.f32 %v379_v6, %v431_v34  ;;  %v882_v40 = vsub.f32 %v394_v0, %v434_v35  ;;  %v458_v41 = vsel %vm402_vm1, %v446_v36, 0.0  ;;  %v455_v42 = vsel %vm402_vm1, %v445_v37, 0.0  ;;  %v621_v6 = vld [vmem:[%s940_s3] ss:$0 sm:$0xff] }
 0x19f   : > { %v426_v43 = vpop.xlane.xlu1 %425  ;;  %459 = vadd.xlane.f32.xlu0 %v458_v41  ;;  %456 = vadd.xlane.f32.xlu1 %v455_v42 }
 0x1a0   : > { %v435_v44 = vmul.f32 0.03125, %v426_v43  ;;  %v450_v45 = vmul.f32 %v882_v40, %v882_v40  ;;  %v447_v49 = vmul.f32 %v880_v39, %v880_v39 }
 0x1a2   : > { %v888_v46 = vsub.f32 %v399_v8, %v435_v44  ;;  %v470_v48 = vsel %vm402_vm1, %v450_v45, 0.0  ;;  %v461_v50 = vsel %vm402_vm1, %v447_v49, 0.0 }
 0x1a3   : > { %468 = vadd.xlane.f32.xlu1 %v467_v47  ;;  %471 = vadd.xlane.f32.xlu0 %v470_v48 }
 0x1a4   : > { %v451_v51 = vmul.f32 %v888_v46, %v888_v46 }
 0x1a6   : > { %v473_v52 = vsel %vm402_vm1, %v451_v51, 0.0 }
 0x1a7   : > { %462 = vadd.xlane.f32.xlu1 %v461_v50 }
 0x1ab   : > { %474 = vadd.xlane.f32.xlu1 %v473_v52 }
 0x224   : > { %v454_v53 = vpop.xlane.xlu0 %453 }
 0x225   : > { %v476_v54 = vmul.f32 0.03125, %v454_v53 }
 0x227   : > { %v484_v55 = vadd.f32 1e-05, %v476_v54 }
 0x228   : > { %v466_v56 = vpop.xlane.xlu0 %465 }
 0x229   : > { %680 = vrsqrt.f32 %v484_v55  ;;  %v480_v57 = vmul.f32 0.03125, %v466_v56 }
 0x22b   : > { %v488_v58 = vadd.f32 1e-05, %v480_v57 }
 0x22c   : > { %v457_v59 = vpop.xlane.xlu1 %456  ;;  %v460_v60 = vpop.xlane.xlu0 %459 }
 0x22d   : > { %682 = vrsqrt.f32 %v488_v58  ;;  %v477_v61 = vmul.f32 0.03125, %v457_v59  ;;  %v478_v62 = vmul.f32 0.03125, %v460_v60 }
 0x22f   : > { %v485_v63 = vadd.f32 1e-05, %v477_v61  ;;  %v486_v0 = vadd.f32 1e-05, %v478_v62 }
 0x230   : > { %v469_v1 = vpop.xlane.xlu1 %468  ;;  %v472_v2 = vpop.xlane.xlu0 %471 }
 0x231   : > { %684 = vrsqrt.f32 %v485_v63  ;;  %v481_v3 = vmul.f32 0.03125, %v469_v1  ;;  %v482_v4 = vmul.f32 0.03125, %v472_v2 }
 0x232   : > { %686 = vrsqrt.f32 %v486_v0 }
 0x233   : > { %v681_v5 = vpop.eup %680  ;;  %v489_v7 = vadd.f32 1e-05, %v481_v3  ;;  %v490_v8 = vadd.f32 1e-05, %v482_v4 }
 0x234   : > { %v500_v9 = vmul.f32 %v681_v5, %v858_v15  ;;  %v463_v10 = vpop.xlane.xlu1 %462 }
 0x235   : > { %688 = vrsqrt.f32 %v489_v7  ;;  %v479_v12 = vmul.f32 0.03125, %v463_v10 }
 0x236   : > { %v515_v13 = vmul.f32 %v621_v6, %v500_v9  ;;  %690 = vrsqrt.f32 %v490_v8 }
 0x237   : > { %v683_v14 = vpop.eup %682  ;;  %v487_v16 = vadd.f32 1e-05, %v479_v12 }
 0x238   : > { %v530_v17 = vadd.f32 %v622_v11, %v515_v13  ;;  %v504_v15 = vmul.f32 %v683_v14, %v862_v21  ;;  %v475_v18 = vpop.xlane.xlu1 %474 }
 0x239   : > { %692 = vrsqrt.f32 %v487_v16  ;;  %v483_v19 = vmul.f32 0.03125, %v475_v18 }
 0x23a   : > { %538 = vst.msk [vmem:[%s909_s23] sm:$0xff] %vm402_vm1, %v530_v17  ;;  %v519_v20 = vmul.f32 %v621_v6, %v504_v15 }
 0x23b   : > { %v685_v22 = vpop.eup %684  ;;  %v491_v23 = vadd.f32 1e-05, %v483_v19 }
 0x23c   : > { %v687_v24 = vpop.eup %686  ;;  %v534_v25 = vadd.f32 %v622_v11, %v519_v20  ;;  %v501_v26 = vmul.f32 %v685_v22, %v871_v30 }
 0x23d   : > { %v502_v27 = vmul.f32 %v687_v24, %v869_v29  ;;  %694 = vrsqrt.f32 %v491_v23 }
 0x23e   : > { %542 = vst.msk [vmem:[%s909_s23 + $0x20] sm:$0xff] %vm402_vm1, %v534_v25  ;;  %v516_v21 = vmul.f32 %v621_v6, %v501_v26 }
 0x23f   : > { %v689_v31 = vpop.eup %688  ;;  %v517_v32 = vmul.f32 %v621_v6, %v502_v27 }
 0x240   : > { %v691_v33 = vpop.eup %690  ;;  %v531_v34 = vadd.f32 %v622_v11, %v516_v21  ;;  %v505_v35 = vmul.f32 %v689_v31, %v867_v28 }
 0x241   : > { %v532_v36 = vadd.f32 %v622_v11, %v517_v32  ;;  %v506_v37 = vmul.f32 %v691_v33, %v882_v40 }
 0x242   : > { %539 = vst.msk [vmem:[%s909_s23 + $0x8] sm:$0xff] %vm402_vm1, %v531_v34  ;;  %v520_v30 = vmul.f32 %v621_v6, %v505_v35 }
 0x243   : > { %v693_v29 = vpop.eup %692  ;;  %540 = vst.msk [vmem:[%s909_s23 + $0x10] sm:$0xff] %vm402_vm1, %v532_v36  ;;  %v521_v38 = vmul.f32 %v621_v6, %v506_v37 }
 0x244   : > { %v535_v41 = vadd.f32 %v622_v11, %v520_v30  ;;  %v503_v42 = vmul.f32 %v693_v29, %v880_v39 }
 0x245   : > { %v536_v43 = vadd.f32 %v622_v11, %v521_v38 }
 0x246   : > { %543 = vst.msk [vmem:[%s909_s23 + $0x28] sm:$0xff] %vm402_vm1, %v535_v41  ;;  %v518_v44 = vmul.f32 %v621_v6, %v503_v42 }
 0x247   : > { %v695_v28 = vpop.eup %694  ;;  %544 = vst.msk [vmem:[%s909_s23 + $0x30] sm:$0xff] %vm402_vm1, %v536_v43 }
 0x248   : > { %v533_v45 = vadd.f32 %v622_v11, %v518_v44  ;;  %v507_v40 = vmul.f32 %v695_v28, %v888_v46 }
 0x24a   : > { %541 = vst.msk [vmem:[%s909_s23 + $0x18] sm:$0xff] %vm402_vm1, %v533_v45  ;;  %v522_v47 = vmul.f32 %v621_v6, %v507_v40 }
 0x24c   : > { %v537_v48 = vadd.f32 %v622_v11, %v522_v47 }
 0x24e   : > { %545 = vst.msk [vmem:[%s909_s23 + $0x38] sm:$0xff] %vm402_vm1, %v537_v48 }
 0x24f PF: > { %s15_s18 = sadd.s32 1, %s702_s18  }
 0x250   : > { %p12_p4 = scmp.ge.s32.totalorder %s15_s18, 4  }
 0x252   :  { %14 = sbr.rel (!%p12_p4) target bundleno = 1 (0x1), region = 70 }

</bundles_post_ra>
